<compile_context>
chip_gen: v7x
topology: tpu7x:2x2x1
jax: 0.10.0
libtpu: 0.0.40
codegen_flags: <defaults>
</compile_context>

<pallas_src>
import functools

import jax
import jax.numpy as jnp
from jax.experimental import pallas as pl
from jax.experimental.pallas import tpu as pltpu


# ---------------------------------------------------------------------------
# Stage 1: streamed channel reduction (mean & max over C), lane-dense layout.
# ---------------------------------------------------------------------------
def _channel_reduce_kernel(x_ref, avg_ref, max_ref, *, inv_c):
    # x_ref  : (1, Ct, HW)  one channel-tile of one batch element (lane-dense)
    # avg_ref: (1, 1, HW)   running sum -> mean (output block revisited over c)
    # max_ref: (1, 1, HW)   running max
    c = pl.program_id(1)
    xb = x_ref[0].astype(jnp.float32)                  # (Ct, HW)
    s = jnp.sum(xb, axis=0, keepdims=True)             # (1, HW)
    m = jnp.max(xb, axis=0, keepdims=True)             # (1, HW)

    @pl.when(c == 0)
    def _init():
        avg_ref[0] = s
        max_ref[0] = m

    @pl.when(c > 0)
    def _accumulate():
        avg_ref[0] = avg_ref[0] + s
        max_ref[0] = jnp.maximum(max_ref[0], m)

    @pl.when(c == pl.num_programs(1) - 1)
    def _finalize():
        avg_ref[0] = avg_ref[0] * inv_c


# ---------------------------------------------------------------------------
# Stage 2: KxK conv (2 -> 1 channels, zero padding, no bias) + sigmoid.
# The conv is expressed as 3*K small matmuls on the otherwise-idle MXU:
#   acc = sum_kh  L[kh] @ ( avg @ T[0,kh]  +  max @ T[1,kh] )
# where T carries the weights + column (kw) shifts/padding and L the row (kh)
# shifts/padding. No padded VMEM scratch, no zeroing, no unaligned loads.
# ---------------------------------------------------------------------------
def _conv_sigmoid_kernel(avg_ref, max_ref, t_ref, l_ref, o_ref, *, K):
    # avg_ref, max_ref: (1, H, W); t_ref: (2, K, W, W); l_ref: (K, H, H)
    avg = avg_ref[0]                                    # (H, W) float32
    mx = max_ref[0]                                     # (H, W) float32
    acc = jnp.zeros(avg.shape, jnp.float32)
    for kh in range(K):                                 # fully unrolled
        inner = (jnp.dot(avg, t_ref[0, kh], preferred_element_type=jnp.float32)
                 + jnp.dot(mx, t_ref[1, kh], preferred_element_type=jnp.float32))
        acc = acc + jnp.dot(l_ref[kh], inner, preferred_element_type=jnp.float32)
    o_ref[0] = jax.nn.sigmoid(acc).astype(o_ref.dtype)


# ---------------------------------------------------------------------------
# Host-side helpers.
# ---------------------------------------------------------------------------
def _channel_tile(C, HW, itemsize, budget_bytes=4 << 20):
    """Largest channel tile whose (Ct, HW) block stays under a per-buffer VMEM
    budget (double-buffered blocks then comfortably fit all generations,
    including v7x's 64 MiB VMEM)."""
    if C * HW * itemsize <= budget_bytes:
        return C
    max_ct = max(8, ((budget_bytes // (HW * itemsize)) // 8) * 8)
    ct = min(max_ct, (C // 8) * 8)
    while ct >= 8:
        if C % ct == 0:
            return ct
        ct -= 8
    return C  # fallback: awkward C, take the whole axis


def _shift_matrices(H, W, K, weight):
    """Fold the KxK conv (incl. zero padding) into matmul factors.

    T[ic, kh, w', w] = weight[0, ic, kh, w' - w + P] (0 outside the kernel)
    L[kh, h, h']     = 1 if h' == h + kh - P else 0
    """
    P = (K - 1) // 2
    w2 = weight.reshape(2, K, K).astype(jnp.float32)
    wp = jnp.arange(W)[:, None]          # source column w'
    wo = jnp.arange(W)[None, :]          # output column w
    d = wp - wo + P                      # (W, W)
    valid = (d >= 0) & (d < K)
    t = jnp.where(valid[None, None, :, :], w2[:, :, jnp.clip(d, 0, K - 1)], 0.0)
    ho = jnp.arange(H)[:, None]          # output row h
    hs = jnp.arange(H)[None, :]          # source row h'
    l = jnp.stack([(hs == ho + kh - P).astype(jnp.float32) for kh in range(K)],
                  axis=0)                # (K, H, H)
    return t, l


def spatial_attention(x, weight):
    """x: (B, C, H, W) NCHW; weight: (1, 2, K, K) conv weight (no bias).
    Returns sigmoid(conv(cat(mean_c, max_c))) with shape (B, 1, H, W)."""
    B, C, H, W = x.shape
    K = weight.shape[-1]
    HW = H * W
    itemsize = jnp.dtype(x.dtype).itemsize
    ct = _channel_tile(C, HW, itemsize)
    n_c = C // ct

    # Lane-dense view for the channel reduction (free metadata reshape).
    x3 = x.reshape(B, C, HW)

    avg_flat, max_flat = pl.pallas_call(
        functools.partial(_channel_reduce_kernel, inv_c=1.0 / C),
        out_shape=(jax.ShapeDtypeStruct((B, 1, HW), jnp.float32),
                   jax.ShapeDtypeStruct((B, 1, HW), jnp.float32)),
        grid=(B, n_c),
        in_specs=[pl.BlockSpec((1, ct, HW), lambda b, c: (b, c, 0))],
        out_specs=(pl.BlockSpec((1, 1, HW), lambda b, c: (b, 0, 0)),
                   pl.BlockSpec((1, 1, HW), lambda b, c: (b, 0, 0))),
        compiler_params=pltpu.CompilerParams(
            dimension_semantics=("parallel", "arbitrary"),
            vmem_limit_bytes=32 * 1024 * 1024),
    )(x3)

    # 2-D (H, W) view only for the tiny conv stage (free reshape in the wrapper).
    avg2 = avg_flat.reshape(B, H, W)
    max2 = max_flat.reshape(B, H, W)
    t_mat, l_mat = _shift_matrices(H, W, K, weight)

    out2 = pl.pallas_call(
        functools.partial(_conv_sigmoid_kernel, K=K),
        out_shape=jax.ShapeDtypeStruct((B, H, W), x.dtype),
        grid=(B,),
        in_specs=[pl.BlockSpec((1, H, W), lambda b: (b, 0, 0)),
                  pl.BlockSpec((1, H, W), lambda b: (b, 0, 0)),
                  pl.BlockSpec((2, K, W, W), lambda b: (0, 0, 0, 0)),
                  pl.BlockSpec((K, H, H), lambda b: (0, 0, 0))],
        out_specs=pl.BlockSpec((1, H, W), lambda b: (b, 0, 0)),
        compiler_params=pltpu.CompilerParams(dimension_semantics=("parallel",)),
    )(avg2, max2, t_mat, l_mat)

    return out2.reshape(B, 1, H, W)


# ---------------------------------------------------------------------------
# Reference (exact elementwise f32 shift-and-accumulate, no conv primitive).
# ---------------------------------------------------------------------------
def _reference(x, weight):
    avg = jnp.mean(x, axis=1, keepdims=True)
    mx = jnp.max(x, axis=1, keepdims=True)
    cat = jnp.concatenate([avg, mx], axis=1)            # (B, 2, H, W)
    K = weight.shape[-1]
    P = (K - 1) // 2
    B, _, H, W = x.shape
    pad = jnp.pad(cat, ((0, 0), (0, 0), (P, P), (P, P)))
    y = jnp.zeros((B, H, W), jnp.float32)
    for ic in range(2):
        for kh in range(K):
            for kw in range(K):
                y = y + weight[0, ic, kh, kw] * pad[:, ic, kh:kh + H, kw:kw + W]
    return jax.nn.sigmoid(y)[:, None]                   # (B, 1, H, W)


if __name__ == "__main__":
    B, C, H, W = 2, 4, 16, 16
    K = 7

    key = jax.random.PRNGKey(0)
    kx, kw = jax.random.split(key)
    x = jax.random.normal(kx, (B, C, H, W), dtype=jnp.float32)
    # Deterministic synthetic conv weight (matches nn.Conv2d(2, 1, 7, bias=False)).
    weight = jax.random.uniform(kw, (1, 2, K, K), dtype=jnp.float32,
                                minval=-0.1, maxval=0.1)

    out = spatial_attention(x, weight)
    out = jax.block_until_ready(out)

    ref = _reference(x, weight)
    assert out.shape == (B, 1, H, W), out.shape
    err = float(jnp.max(jnp.abs(out - ref)))
    # Tolerance covers MXU f32 matmul pass rounding vs. exact elementwise ref.
    assert err < 5e-4, err

    print("KERNEL_OK")
</pallas_src>

<mosaic_0001>
module attributes {stable_mosaic.version = 11 : i64} {
  func.func @_channel_reduce_kernel(%arg0: i32, %arg1: i32, %arg2: memref<1x4x256xf32, #tpu.memory_space<vmem>>, %arg3: memref<1x1x256xf32, #tpu.memory_space<vmem>>, %arg4: memref<1x1x256xf32, #tpu.memory_space<vmem>>) attributes {dimension_semantics = [#tpu.dimension_semantics<parallel>, #tpu.dimension_semantics<arbitrary>], iteration_bounds = array<i64: 2, 1>, scalar_prefetch = 0 : i64, scratch_operands = 0 : i64, tpu.core_type = #tpu.core_type<tc>, window_params = [{transform_indices = @transform_0, window_bounds = array<i64: 1, 4, 256>}, {transform_indices = @transform_1, window_bounds = array<i64: 1, 1, 256>}, {transform_indices = @transform_2, window_bounds = array<i64: 1, 1, 256>}]} {
    %c0 = arith.constant 0 : index
    %c0_0 = arith.constant 0 : index
    %c0_1 = arith.constant 0 : index
    %0 = vector.load %arg2[%c0, %c0_0, %c0_1] : memref<1x4x256xf32, #tpu.memory_space<vmem>>, vector<1x4x256xf32>
    %1 = vector.shape_cast %0 : vector<1x4x256xf32> to vector<4x256xf32>
    %cst = arith.constant dense<0.000000e+00> : vector<256xf32>
    %2 = vector.multi_reduction <add>, %1, %cst [0] : vector<4x256xf32> to vector<256xf32>
    %3 = vector.shape_cast %2 : vector<256xf32> to vector<1x256xf32>
    %cst_2 = arith.constant dense<0xFF800000> : vector<256xf32>
    %4 = vector.multi_reduction <maximumf>, %1, %cst_2 [0] : vector<4x256xf32> to vector<256xf32>
    %5 = vector.shape_cast %4 : vector<256xf32> to vector<1x256xf32>
    %c0_i32 = arith.constant 0 : i32
    %6 = arith.cmpi eq, %arg1, %c0_i32 : i32
    %7 = arith.extui %6 : i1 to i32
    %c0_i32_3 = arith.constant 0 : i32
    %8 = arith.cmpi ne, %7, %c0_i32_3 : i32
    scf.if %8 {
      %c0_8 = arith.constant 0 : index
      %c0_9 = arith.constant 0 : index
      %c0_10 = arith.constant 0 : index
      %15 = vector.load %arg3[%c0_8, %c0_9, %c0_10] : memref<1x1x256xf32, #tpu.memory_space<vmem>>, vector<1x1x256xf32>
      %16 = vector.shape_cast %15 : vector<1x1x256xf32> to vector<1x256xf32>
      %17 = vector.shape_cast %3 : vector<1x256xf32> to vector<1x1x256xf32>
      tpu.vector_store %arg3[%c0_8, %c0_9, %c0_10], %17 {strides = array<i32>} : memref<1x1x256xf32, #tpu.memory_space<vmem>>, vector<1x1x256xf32>,
      %c0_11 = arith.constant 0 : index
      %c0_12 = arith.constant 0 : index
      %c0_13 = arith.constant 0 : index
      %18 = vector.load %arg4[%c0_11, %c0_12, %c0_13] : memref<1x1x256xf32, #tpu.memory_space<vmem>>, vector<1x1x256xf32>
      %19 = vector.shape_cast %18 : vector<1x1x256xf32> to vector<1x256xf32>
      %20 = vector.shape_cast %5 : vector<1x256xf32> to vector<1x1x256xf32>
      tpu.vector_store %arg4[%c0_11, %c0_12, %c0_13], %20 {strides = array<i32>} : memref<1x1x256xf32, #tpu.memory_space<vmem>>, vector<1x1x256xf32>,
    } else {
    }
    %c0_i32_4 = arith.constant 0 : i32
    %9 = arith.cmpi sgt, %arg1, %c0_i32_4 : i32
    %10 = arith.extui %9 : i1 to i32
    %c0_i32_5 = arith.constant 0 : i32
    %11 = arith.cmpi ne, %10, %c0_i32_5 : i32
    scf.if %11 {
      %c0_8 = arith.constant 0 : index
      %c0_9 = arith.constant 0 : index
      %c0_10 = arith.constant 0 : index
      %15 = vector.load %arg3[%c0_8, %c0_9, %c0_10] : memref<1x1x256xf32, #tpu.memory_space<vmem>>, vector<1x1x256xf32>
      %16 = vector.shape_cast %15 : vector<1x1x256xf32> to vector<1x256xf32>
      %17 = arith.addf %16, %3 : vector<1x256xf32>
      %c0_11 = arith.constant 0 : index
      %c0_12 = arith.constant 0 : index
      %c0_13 = arith.constant 0 : index
      %18 = vector.load %arg3[%c0_11, %c0_12, %c0_13] : memref<1x1x256xf32, #tpu.memory_space<vmem>>, vector<1x1x256xf32>
      %19 = vector.shape_cast %18 : vector<1x1x256xf32> to vector<1x256xf32>
      %20 = vector.shape_cast %17 : vector<1x256xf32> to vector<1x1x256xf32>
      tpu.vector_store %arg3[%c0_11, %c0_12, %c0_13], %20 {strides = array<i32>} : memref<1x1x256xf32, #tpu.memory_space<vmem>>, vector<1x1x256xf32>,
      %c0_14 = arith.constant 0 : index
      %c0_15 = arith.constant 0 : index
      %c0_16 = arith.constant 0 : index
      %21 = vector.load %arg4[%c0_14, %c0_15, %c0_16] : memref<1x1x256xf32, #tpu.memory_space<vmem>>, vector<1x1x256xf32>
      %22 = vector.shape_cast %21 : vector<1x1x256xf32> to vector<1x256xf32>
      %23 = arith.maximumf %22, %5 : vector<1x256xf32>
      %c0_17 = arith.constant 0 : index
      %c0_18 = arith.constant 0 : index
      %c0_19 = arith.constant 0 : index
      %24 = vector.load %arg4[%c0_17, %c0_18, %c0_19] : memref<1x1x256xf32, #tpu.memory_space<vmem>>, vector<1x1x256xf32>
      %25 = vector.shape_cast %24 : vector<1x1x256xf32> to vector<1x256xf32>
      %26 = vector.shape_cast %23 : vector<1x256xf32> to vector<1x1x256xf32>
      tpu.vector_store %arg4[%c0_17, %c0_18, %c0_19], %26 {strides = array<i32>} : memref<1x1x256xf32, #tpu.memory_space<vmem>>, vector<1x1x256xf32>,
    } else {
    }
    %c0_i32_6 = arith.constant 0 : i32
    %12 = arith.cmpi eq, %arg1, %c0_i32_6 : i32
    %13 = arith.extui %12 : i1 to i32
    %c0_i32_7 = arith.constant 0 : i32
    %14 = arith.cmpi ne, %13, %c0_i32_7 : i32
    scf.if %14 {
      %c0_8 = arith.constant 0 : index
      %c0_9 = arith.constant 0 : index
      %c0_10 = arith.constant 0 : index
      %15 = vector.load %arg3[%c0_8, %c0_9, %c0_10] : memref<1x1x256xf32, #tpu.memory_space<vmem>>, vector<1x1x256xf32>
      %16 = vector.shape_cast %15 : vector<1x1x256xf32> to vector<1x256xf32>
      %cst_11 = arith.constant 2.500000e-01 : f32
      %17 = vector.broadcast %cst_11 : f32 to vector<1x256xf32>
      %18 = arith.mulf %16, %17 : vector<1x256xf32>
      %c0_12 = arith.constant 0 : index
      %c0_13 = arith.constant 0 : index
      %c0_14 = arith.constant 0 : index
      %19 = vector.load %arg3[%c0_12, %c0_13, %c0_14] : memref<1x1x256xf32, #tpu.memory_space<vmem>>, vector<1x1x256xf32>
      %20 = vector.shape_cast %19 : vector<1x1x256xf32> to vector<1x256xf32>
      %21 = vector.shape_cast %18 : vector<1x256xf32> to vector<1x1x256xf32>
      tpu.vector_store %arg3[%c0_12, %c0_13, %c0_14], %21 {strides = array<i32>} : memref<1x1x256xf32, #tpu.memory_space<vmem>>, vector<1x1x256xf32>,
    } else {
    }
    return
  }
  func.func @transform_0(%arg0: i32, %arg1: i32) -> (i32, i32, i32) {
    %c0_i32 = arith.constant 0 : i32
    %c0_i32_0 = arith.constant 0 : i32
    return %arg0, %arg1, %c0_i32 : i32, i32, i32
  }
  func.func @transform_1(%arg0: i32, %arg1: i32) -> (i32, i32, i32) {
    %c0_i32 = arith.constant 0 : i32
    %c0_i32_0 = arith.constant 0 : i32
    %c0_i32_1 = arith.constant 0 : i32
    return %arg0, %c0_i32, %c0_i32_0 : i32, i32, i32
  }
  func.func @transform_2(%arg0: i32, %arg1: i32) -> (i32, i32, i32) {
    %c0_i32 = arith.constant 0 : i32
    %c0_i32_0 = arith.constant 0 : i32
    %c0_i32_1 = arith.constant 0 : i32
    return %arg0, %c0_i32, %c0_i32_0 : i32, i32, i32
  }
}

</mosaic_0001>

<bundles_post_ra>
// kernel: tpu_custom_call.1
= control target key start
LH: loop header
LB: loop body
LE: loop exit
PB: predicated region body
PF: predicated region fallthrough
CT: control target
= control target key end

     0   :  { %8 = vsyncpa [#allocation3], 0  ;;  %s951_s0 = inlined_call_operand.hbm [shape: f32[2,4,256], index: 0, kind: input, shape index: {}]   ;;  %s952_s1 = inlined_call_operand.hbm [shape: f32[2,1,256], index: 1, kind: output, shape index: {0}]   ;;  %s953_s2 = inlined_call_operand.hbm [shape: f32[2,1,256], index: 2, kind: output, shape index: {1}]  }
   0x1   :  { %10 = vsyncpa [#allocation3 + $0x1], 0 }
   0x2   :  { %11 = vsyncpa [#allocation4], 0 }
   0x3   :  { %13 = vsyncpa [#allocation4 + $0x1], 0 }
   0x4   :  { %14 = vsyncpa [#allocation7], 0 }
   0x5   :  { %16 = vsyncpa [#allocation7 + $0x1], 0  ;;  %s729_s9 = smov 0   ;;  %s731_s10 = smov 0  }
   0x6   :  { %s733_s11 = smov 0   ;;  %s735_s12 = smov 0  }
   0x7   :  { %s737_s13 = smov 0   ;;  %s739_s14 = smov 0  }
   0x8 LB: > { %s473_s15 = sadd.s32 4294967295, %s708_s14   ;;  %s474_s16 = sadd.s32 4294967294, %s708_s14   ;;  %s708_s14 = sphi %s739_s14, %s22_s14   ;;  %s704_s13 = sphi %s737_s13, %s971_s13   ;;  %s700_s12 = sphi %s735_s12, %s970_s12   ;;  %s696_s11 = sphi %s733_s11, %s969_s11   ;;  %s692_s10 = sphi %s731_s10, %s968_s10   ;;  %s688_s9 = sphi %s729_s9, %s967_s9  }
   0x9   : > { %s34_s17 = sadd.s32 1, %s704_s13  ;;  %s43_s18 = sadd.s32 1, %s696_s11 }
   0xa   : > { %p36_p0 = scmp.ge.s32.totalorder %s34_s17, 2  ;;  %p50_p1 = scmp.ne.s32.totalorder %s696_s11, %s692_s10 }
   0xb   : > { %p51_p2 = scmp.eq.s32.totalorder %s708_s14, 0  ;;  %p56_p3 = scmp.ne.s32.totalorder %s692_s10, %s688_s9 }
   0xc   : > { %s973_s17 = smov (%p36_p0, %s34_s17), 0  ;;  %p57_p5 = scmp.eq.s32.totalorder %s473_s15, 0 }
   0xd   : > { %p770_p4 = por %p51_p2, %p50_p1  ;;  %s38_s20 = ssub.s32 %s704_s13, %s973_s17 }
   0xe   : > { %p80_p6 = scmp.eq.s32.totalorder %s473_s15, 1  ;;  %p41_p7 = scmp.eq.s32.totalorder %s38_s20, 0 }
   0xf   : > { %p776_p8 = por %p57_p5, %p56_p3  ;;  %p86_p10 = scmp.eq.s32.totalorder %s474_s16, 1 }
  0x10   : > { %p780_p9 = por %p80_p6, %p50_p1  ;;  %p512_p13 = scmp.lt.s32.totalorder %s708_s14, 2 }
  0x11   : > { %s785_s23 = scalar_select %p41_p7, %s696_s11, %s43_s18  }
  0x12   : > { %s957_s22 = scalar_select %p780_p9, 1, 0 }
  0x13   : > { %p787_p11 = por %p86_p10, %p56_p3  ;;  %s132_s25 = sand.u32 1, %s696_s11  }
  0x14   : > { %s477_s26 = sshll.u32 %s132_s25, 3  ;;  %s492_s27 = sshll.u32 %s704_s13, 7 }
  0x15   : > { %s958_s24 = scalar_select %p787_p11, 1, 0 }
  0x16   : > { %s798_s30 = scalar_lea.hbm %s951_s0, %s492_s27  ;;  %s136_s3 = scalar_lea.vmem [#allocation2], %s477_s26 }
  0x17   : > { %s146_s4 = sshll.u32 %s136_s3, 4  ;;  %p804_p0 = pnand %p512_p13, %p770_p4  ;;  %s800_s4 = int_to_ptr.vmem [resolvable:$true] %s146_s4 }
  0x18   : > { %s133_s6 = scalar_lea.sflag [#allocation3], %s132_s25  ;;  %s564_s7 = scalar_lea.hbm %s798_s30, 128 }
  0x19   : > { %p565_p3 = scmp.ne.s32.totalorder %s798_s30, %s564_s7  ;;  %p566_p5 = pneg %p804_p0 }
  0x1a   : > { %s569_s16 = scalar_lea.hbm %s951_s0, 256  ;;  %p570_p4 = scmp.lt.u32.totalorder %s798_s30, %s951_s0 }
  0x1b   : > { %p567_p6 = pnand %p566_p5, %p565_p3  ;;  %p571_p10 = scmp.lt.u32.totalorder %s569_s16, %s564_s7 }
  0x1c   : > { %p573_p12 = scmp.lt.u32.totalorder %s564_s7, %s798_s30 }
  0x1d   : > { %p568_p7 = pneg %p567_p6  ;;  %p572_p13 = por %p571_p10, %p570_p4 }
  0x1f   : > { %p574_p1 = por %p573_p12, %p572_p13 }
  0x21   : > { %p575_p2 = pnand %p574_p1, %p568_p7 }
  0x23   : > { %578 = shalt.err (!%p575_p2)
}
  0x24   : > { %s579_s20 = scalar_lea.vmem %s800_s4, 128  ;;  %s710_s25 = smov [#allocation2]  }
  0x25   : > { %p580_p3 = scmp.ne.s32.totalorder %s800_s4, %s579_s20  ;;  %s584_s26 = sshll.u32 %s710_s25, 4  ;;  %s585_s26 = int_to_ptr.vmem [resolvable:$false] %s584_s26 }
  0x26   : > { %s586_s27 = scalar_lea.vmem %s585_s26, 256  ;;  %p587_p9 = scmp.lt.s32.totalorder %s800_s4, %s585_s26 }
  0x27   : > { %p582_p6 = pnand %p580_p3, %p566_p5  ;;  %p588_p4 = scmp.lt.s32.totalorder %s586_s27, %s579_s20 }
  0x29   : > { %p583_p11 = pneg %p582_p6  ;;  %p589_p10 = por %p588_p4, %p587_p9 }
  0x2b   : > { %p590_p12 = pnand %p589_p10, %p583_p11 }
  0x2d   : > { %593 = shalt.err (!%p590_p12)
}
  0x2e   : > { %504 = dma.hbm_to_vmem [thread:$0]  (!%p804_p0), %s798_s30, 128, %s800_s4, %s133_s6  }
  0x2f   : > { %p960_p1 = scmp.lt.s32.totalorder %s708_s14, 3  ;;  %p961_p2 = scmp.ge.s32.totalorder %s708_s14, 1 }
  0x31   : > { %p152_p5 = pnand %p961_p2, %p960_p1 }
  0x32   : > { %s840_s28 = sand.u32 (!%p152_p5), 1, %s692_s10  }
  0x33   : > { %155 = sbr.rel (%p152_p5) target bundleno = 119 (0x77), region = 24  ;;  %s481_s29 = sshll.u32 (!%p152_p5), %s840_s28, 3 }
  0x34   : > { %s158_s3 = scalar_lea.sflag (!%p152_p5), [#allocation3], %s840_s28  ;;  %s161_s7 = scalar_lea.vmem (!%p152_p5), [#allocation2], %s481_s29 }
  0x3a   : > { %675 = dma.done.wait (%p776_p8), %s158_s3, 128  }
  0x3b   : > { %677 = vsyncadd (%p776_p8), %s158_s3, 4294967168  ;;  %vm191_vm0 = vcmask 1043456   ;;  %v187_v0 = vld [vmem:[%s161_s7] sm:$0xff]  ;;  %v711_v12 = vmov 1966171168   ;;  %v230_v14 = vlaneseq  ;;  %s482_s21 = sshll.u32 %s840_s28, 1 }
  0x3c   : > { %v189_v1 = vcombine.high %v187_v0, %v187_v0  ;;  %v192_v2 = vsel %vm191_vm0, %v187_v0, 0.0  ;;  %v206_v3 = vsel %vm191_vm0, %v187_v0, -inf  ;;  %v228_v13 = vunpack.c.l.s4 %v711_v12  ;;  %s186_s30 = scalar_lea.vmem [#allocation6], %s482_s21  ;;  %s493_s5 = sshll.u32 %s700_s12, 5 }
  0x3d   : > { %v193_v4 = vrot.slane %v192_v2, 4  ;;  %v207_v5 = vrot.slane %v206_v3, 4  ;;  %v231_v24 = vshrl.u32 %v230_v14, 7  ;;  %s360_s4 = sshll.u32 %s186_s30, 4  ;;  %vm850_vm1 = vcmp.lt.s32.totalorder %v230_v14, 256  ;;  %s861_s15 = scalar_lea.hbm %s953_s2, %s493_s5  ;;  %s854_s4 = int_to_ptr.vmem [resolvable:$true] %s360_s4 }
  0x3e   : > { %v199_v6 = vsel %vm191_vm0, %v189_v1, 0.0  ;;  %v213_v7 = vsel %vm191_vm0, %v189_v1, -inf  ;;  %v229_v23 = vunpack.c.0.s8 %v228_v13  ;;  %s863_s16 = scalar_lea.vmem [#allocation5], %s482_s21  ;;  %s332_s18 = scalar_lea.sflag [#allocation7], %s840_s28 }
  0x3f   : > { %v194_v8 = vadd.f32 %v193_v4, %v192_v2  ;;  %v200_v9 = vrot.slane %v199_v6, 4  ;;  %v208_v10 = vmax.f32 %v206_v3, %v207_v5  ;;  %v214_v11 = vrot.slane %v213_v7, 4  ;;  %s594_s19 = scalar_lea.vmem %s854_s4, 32  ;;  %p964_p9 = scmp.ne.s32.totalorder %s957_s22, 0 }
  0x40   : > { %v232_v34 = vsub.s32 %v229_v23, %v231_v24  ;;  %p595_p8 = scmp.ne.s32.totalorder %s854_s4, %s594_s19  ;;  %s712_s20 = smov [#allocation6]  }
  0x41   : > { %v195_v15 = vrot.slane %v194_v8, 2  ;;  %v201_v16 = vadd.f32 %v200_v9, %v199_v6  ;;  %v209_v17 = vrot.slane %v208_v10, 2  ;;  %v215_v18 = vmax.f32 %v213_v7, %v214_v11  ;;  %s598_s25 = sshll.u32 %s712_s20, 4  ;;  %s599_s25 = int_to_ptr.vmem [resolvable:$false] %s598_s25 }
  0x42   : > { %p596_p11 = pnand %p595_p8, %p964_p9  ;;  %s600_s26 = scalar_lea.vmem %s599_s25, 64 }
  0x43   : > { %v196_v19 = vadd.f32 %v195_v15, %v194_v8  ;;  %v202_v20 = vrot.slane %v201_v16, 2  ;;  %v210_v21 = vmax.f32 %v208_v10, %v209_v17  ;;  %v216_v22 = vrot.slane %v215_v18, 2  ;;  %p601_p7 = scmp.lt.s32.totalorder %s854_s4, %s599_s25  ;;  %p602_p13 = scmp.lt.s32.totalorder %s600_s26, %s594_s19 }
  0x44   : > { %p597_p0 = pneg %p596_p11 }
  0x45   : > { %v197_v25 = vrot.slane %v196_v19, 1  ;;  %v203_v26 = vadd.f32 %v202_v20, %v201_v16  ;;  %v211_v27 = vrot.slane %v210_v21, 1  ;;  %v217_v28 = vmax.f32 %v215_v18, %v216_v22  ;;  %p603_p3 = por %p602_p13, %p601_p7 }
  0x47   : > { %v198_v29 = vadd.f32 %v197_v25, %v196_v19  ;;  %v204_v30 = vrot.slane %v203_v26, 1  ;;  %v212_v31 = vmax.f32 %v210_v21, %v211_v27  ;;  %v218_v32 = vrot.slane %v217_v28, 1  ;;  %p604_p6 = pnand %p603_p3, %p597_p0 }
  0x49   : > { %v205_v33 = vadd.f32 %v204_v30, %v203_v26  ;;  %v219_v35 = vmax.f32 %v217_v28, %v218_v32 }
  0x4b   : > { %v226_v36 = vcombine.low %v198_v29, %v205_v33  ;;  %v249_v37 = vcombine.low %v212_v31, %v219_v35 }
  0x4d   : > { %v233_v38 = vrot.slane %v226_v36, %v232_v34  ;;  %v256_v39 = vrot.slane %v249_v37, %v232_v34 }
  0x4f   : > { %v240_v41 = vrot.slane %v233_v38, %v232_v34  ;;  %v263_v42 = vrot.slane %v256_v39, %v232_v34 }
  0x51   : > { %246 = vst.msk [vmem:[%s863_s16] sm:$0x3] %vm850_vm1, %v240_v41  ;;  %265 = vst.msk [vmem:[%s186_s30] sm:$0x3] %vm850_vm1, %v263_v42 }
  0x52   : > { %607 = shalt.err (!%p604_p6)
}
  0x53   : > { %s608_s27 = scalar_lea.hbm %s861_s15, 32  ;;  %s612_s7 = scalar_lea.hbm %s953_s2, 64 }
  0x54   : > { %p609_p4 = scmp.ne.s32.totalorder %s861_s15, %s608_s27  ;;  %p613_p1 = scmp.lt.u32.totalorder %s861_s15, %s953_s2 }
  0x55   : > { %p614_p2 = scmp.lt.u32.totalorder %s612_s7, %s608_s27  ;;  %p616_p8 = scmp.lt.u32.totalorder %s608_s27, %s861_s15 }
  0x56   : > { %p610_p10 = pnand %p609_p4, %p964_p9 }
  0x57   : > { %p615_p5 = por %p614_p2, %p613_p1 }
  0x58   : > { %p611_p12 = pneg %p610_p10 }
  0x59   : > { %p617_p11 = por %p616_p8, %p615_p5 }
  0x5b   : > { %p618_p0 = pnand %p617_p11, %p611_p12 }
  0x5d   : > { %621 = shalt.err (!%p618_p0)
}
  0x5e   : > { %498 = dma.vmem_to_hbm [thread:$0]  (%p964_p9), %s854_s4, 32, %s861_s15, %s332_s18   ;;  %v319_v43 = vld [vmem:[%s863_s16] sm:$0x3] }
  0x5f   : > { %s346_s6 = sshll.u32 %s863_s16, 4  ;;  %v320_v44 = vmul.f32 0.25, %v319_v43  ;;  %s899_s20 = scalar_lea.hbm %s952_s1, %s493_s5  ;;  %s901_s6 = int_to_ptr.vmem [resolvable:$true] %s346_s6 }
  0x60   : > { %s327_s25 = scalar_lea.sflag [#allocation4], %s840_s28  ;;  %s622_s26 = scalar_lea.vmem %s901_s6, 32 }
  0x61   : > { %325 = vst.msk [vmem:[%s863_s16] sm:$0x3] %vm850_vm1, %v320_v44  ;;  %p623_p7 = scmp.ne.s32.totalorder %s901_s6, %s622_s26  ;;  %s713_s12 = smov [#allocation5]  }
  0x62   : > { %s626_s4 = sshll.u32 %s713_s12, 4  ;;  %s627_s4 = int_to_ptr.vmem [resolvable:$false] %s626_s4 }
  0x63   : > { %p624_p13 = pnand %p623_p7, %p964_p9  ;;  %s628_s15 = scalar_lea.vmem %s627_s4, 64 }
  0x64   : > { %p629_p6 = scmp.lt.s32.totalorder %s901_s6, %s627_s4  ;;  %p630_p4 = scmp.lt.s32.totalorder %s628_s15, %s622_s26 }
  0x65   : > { %p625_p3 = pneg %p624_p13 }
  0x66   : > { %p631_p10 = por %p630_p4, %p629_p6 }
  0x68   : > { %p632_p12 = pnand %p631_p10, %p625_p3 }
  0x6a   : > { %635 = shalt.err (!%p632_p12)
}
  0x6b   : > { %s636_s28 = scalar_lea.hbm %s899_s20, 32  ;;  %s640_s18 = scalar_lea.hbm %s952_s1, 64 }
  0x6c   : > { %p637_p1 = scmp.ne.s32.totalorder %s899_s20, %s636_s28  ;;  %p641_p8 = scmp.lt.u32.totalorder %s899_s20, %s952_s1 }
  0x6d   : > { %p642_p11 = scmp.lt.u32.totalorder %s640_s18, %s636_s28  ;;  %p644_p7 = scmp.lt.u32.totalorder %s636_s28, %s899_s20 }
  0x6e   : > { %p638_p2 = pnand %p637_p1, %p964_p9 }
  0x6f   : > { %p643_p0 = por %p642_p11, %p641_p8 }
  0x70   : > { %p639_p5 = pneg %p638_p2 }
  0x71   : > { %p645_p13 = por %p644_p7, %p643_p0 }
  0x73   : > { %p646_p3 = pnand %p645_p13, %p639_p5 }
  0x75   : > { %649 = shalt.err (!%p646_p3)
}
  0x76   : > { %497 = dma.vmem_to_hbm [thread:$0]  (%p964_p9), %s901_s6, 32, %s899_s20, %s327_s25  }
  0x77 PF: > { %s372_s3 = sand.u32 1, %s688_s9   ;;  %p965_p6 = scmp.ne.s32.totalorder %s958_s24, 0 }
  0x78   : > { %p966_p4 = scmp.ge.s32.totalorder %s708_s14, 2  ;;  %s373_s7 = scalar_lea.sflag [#allocation4], %s372_s3 }
  0x7a   : > { %p506_p10 = pnand %p966_p4, %p965_p6 }
  0x7c   : > { %679 = dma.done.wait (!%p506_p10), %s373_s7, 32  }
  0x7d   : > { %681 = vsyncadd (!%p506_p10), %s373_s7, 4294967264  ;;  %s382_s21 = scalar_lea.sflag [#allocation7], %s372_s3 }
  0x7e   : > { %683 = dma.done.wait (!%p506_p10), %s382_s21, 32  }
  0x7f   : > { %685 = vsyncadd (!%p506_p10), %s382_s21, 4294967264  ;;  %s22_s14 = sadd.s32 1, %s708_s14   ;;  %s967_s9 = smov %s692_s10 }
  0x80   : > { %p19_p12 = scmp.ge.s32.totalorder %s22_s14, 4   ;;  %s968_s10 = smov %s696_s11 }
  0x81   : > { %s969_s11 = smov %s785_s23  ;;  %s970_s12 = smov %s704_s13 }
  0x82   : > { %s971_s13 = smov %s973_s17  ;;  %21 = sbr.rel (!%p19_p12) target bundleno = 8 (0x8), region = 98 }
  0x89   :  { %387 = vsyncpa [#allocation3], 1 }
  0x8a   :  { %389 = vsyncpa [#allocation3 + $0x1], 1 }
  0x8b   :  { %390 = vsyncpa [#allocation4], 1 }
  0x8c   :  { %392 = vsyncpa [#allocation4 + $0x1], 1 }
  0x8d   :  { %393 = vsyncpa [#allocation7], 1 }
  0x8e   :  { %395 = vsyncpa [#allocation7 + $0x1], 1 }

</bundles_post_ra>
